<compile_context>
chip_gen: v6e
topology: v6e:2x2x1
jax: 0.10.0
libtpu: 0.0.40
codegen_flags: <defaults>
</compile_context>

<pallas_src>
import functools

import jax
import jax.numpy as jnp
from jax import lax
from jax.experimental import pallas as pl
from jax.experimental.pallas import tpu as pltpu

NN_LAYERS = [8, 16, 32, 13]   # matches poseNetv1 default
NEG_SLOPE = 0.01              # nn.LeakyReLU default
D_IN = 15                     # [x0,y0,x1,y1,score,lex,ley,rex,rey,nx,ny,lmx,lmy,rmx,rmy]
# x-columns that carry the 8 MLP input features, in the torch feature order
# [lex', ley', rex', rey', lmx', lmy', rmx', rmy']:
LANDMARK_COLS = (5, 6, 7, 8, 11, 12, 13, 14)


def _round_up(n, m):
    return ((n + m - 1) // m) * m


def _leaky(v):
    return jnp.where(v >= 0, v, NEG_SLOPE * v)


def posenet_kernel(x_ref, w1_ref, b1_ref, w2_ref, b2_ref, w3_ref, b3_ref, o_ref,
                   *, sub, n_sub):
    # Hoist VMEM-resident weights / biases and the constant lane-parity mask out
    # of the chunk loop (JAX does not CSE broadcasts inside loops).
    w1 = w1_ref[...]          # [15, 16] (zero rows on non-landmark lanes)
    b1 = b1_ref[...]          # [1, 16]
    w2 = w2_ref[...]          # [16, 32]
    b2 = b2_ref[...]          # [1, 32]
    w3 = w3_ref[...]          # [32, 13]
    b3 = b3_ref[...]          # [1, 13]

    lane = lax.broadcasted_iota(jnp.int32, (sub, D_IN), 1)
    is_x_lane = (lane % 2) == 1   # landmark x coords live on odd lanes (5,7,9,11,13)

    def chunk(c, carry):
        r0 = pl.multiple_of(c * sub, sub)
        xv = x_ref[pl.ds(r0, sub), :]                       # [sub, 15]

        # ---- format(): nose-centered, bbox-relative normalization ----------
        # (col - cx)/w - (nose - cx)/w == (col - nose)/w  (cx/cy cancel exactly)
        width = xv[:, 2:3] - xv[:, 0:1] + 0.001             # [sub, 1]
        height = xv[:, 3:4] - xv[:, 1:2] + 0.001
        inv_w = 1.0 / width
        inv_h = 1.0 / height
        nose_x = xv[:, 9:10]
        nose_y = xv[:, 10:11]

        nose = jnp.where(is_x_lane, nose_x, nose_y)         # [sub, 15]
        scale = jnp.where(is_x_lane, inv_w, inv_h)          # [sub, 15]
        # Whole-row features; non-landmark lanes are killed by zero rows of w1,
        # and the nose lanes are exactly 0 by construction.
        feats = (xv - nose) * scale                         # [sub, 15]

        # ---- MLP: Linear(8,16) -> LeakyReLU -> Linear(16,32) -> LeakyReLU
        #           -> Dropout (identity at inference) -> Linear(32,13) -> LeakyReLU
        h1 = _leaky(jnp.dot(feats, w1, preferred_element_type=jnp.float32) + b1)
        h2 = _leaky(jnp.dot(h1, w2, preferred_element_type=jnp.float32) + b2)
        # TODO(synk): nn.Dropout(p=0.9) is identity in eval mode; train-mode
        # masking would need pltpu.prng_* and is intentionally omitted.
        h3 = _leaky(jnp.dot(h2, w3, preferred_element_type=jnp.float32) + b3)

        o_ref[pl.ds(r0, sub), :] = h3.astype(o_ref.dtype)
        return carry

    lax.fori_loop(0, n_sub, chunk, 0, unroll=True)


def _pack_w1(w1):
    """Scatter the [8, 16] first-layer weight into a [15, 16] matrix whose rows
    line up with the raw input lanes (zero rows for bbox/score/nose lanes).
    One-time layout plumbing; lets the kernel feed the un-gathered row."""
    w1_full = jnp.zeros((D_IN, w1.shape[1]), w1.dtype)
    return w1_full.at[jnp.array(LANDMARK_COLS)].set(w1)


def posenet_forward(x, params, *, tb=512):
    """x: [B, 15] float32; params: (w1[8,16], b1[1,16], w2[16,32], b2[1,32],
    w3[32,13], b3[1,13]) with weights stored [in, out]."""
    B = x.shape[0]
    fout = NN_LAYERS[-1]
    w1, b1, w2, b2, w3, b3 = params
    w1p = _pack_w1(w1)   # in production, pack once at weight-load time

    # ---- batch tile size: multiple of 8; multiple of the 128-row sub-chunk
    # when large enough.  Pad B up to a multiple of TB (padded rows are sliced
    # off the output).
    TB = min(tb, max(B, 8))
    TB = _round_up(TB, 128) if TB > 128 else _round_up(TB, 8)
    SUB = min(TB, 128)
    Bp = _round_up(B, TB)
    if Bp != B:
        x = jnp.pad(x, ((0, Bp - B), (0, 0)))

    grid = (Bp // TB,)
    const = lambda i: (0, 0)
    in_specs = [
        pl.BlockSpec((TB, D_IN), lambda i: (i, 0)),          # x: tiled over batch
        pl.BlockSpec(w1p.shape, const),                      # weights/biases: resident
        pl.BlockSpec(b1.shape, const),
        pl.BlockSpec(w2.shape, const),
        pl.BlockSpec(b2.shape, const),
        pl.BlockSpec(w3.shape, const),
        pl.BlockSpec(b3.shape, const),
    ]
    out_specs = pl.BlockSpec((TB, fout), lambda i: (i, 0))

    kernel = functools.partial(posenet_kernel, sub=SUB, n_sub=TB // SUB)
    y = pl.pallas_call(
        kernel,
        out_shape=jax.ShapeDtypeStruct((Bp, fout), jnp.float32),
        grid=grid,
        in_specs=in_specs,
        out_specs=out_specs,
        compiler_params=pltpu.CompilerParams(
            dimension_semantics=("parallel",)),
    )(x, w1p, b1, w2, b2, w3, b3)
    return y[:B] if Bp != B else y


def init_params(key):
    """Deterministic PyTorch-style (uniform +/- 1/sqrt(fan_in)) init.
    Weights stored as [in, out] (transposed vs. torch's [out, in])."""
    params = []
    for i in range(len(NN_LAYERS) - 1):
        fin, fo = NN_LAYERS[i], NN_LAYERS[i + 1]
        key, kw, kb = jax.random.split(key, 3)
        bound = 1.0 / (fin ** 0.5)
        w = jax.random.uniform(kw, (fin, fo), jnp.float32, -bound, bound)
        b = jax.random.uniform(kb, (1, fo), jnp.float32, -bound, bound)
        params.extend([w, b])
    return tuple(params)


def posenet_reference(x, params):
    """Pure-JAX reference, faithful to the torch format()/net order."""
    w1, b1, w2, b2, w3, b3 = params
    bbox = x[:, :4]
    lm = x[:, 5:]
    width = (bbox[:, 2] - bbox[:, 0])[:, None] + 0.001
    height = (bbox[:, 3] - bbox[:, 1])[:, None] + 0.001
    cx = ((bbox[:, 2] + bbox[:, 0]) / 2)[:, None]
    cy = ((bbox[:, 3] + bbox[:, 1]) / 2)[:, None]
    lx = (lm[:, 0::2] - cx) / width
    ly = (lm[:, 1::2] - cy) / height
    lx = lx - lx[:, 2:3]
    ly = ly - ly[:, 2:3]
    idx = [0, 1, 3, 4]
    feats = jnp.stack([v for i in idx for v in (lx[:, i], ly[:, i])], axis=1)
    h1 = _leaky(feats @ w1 + b1)
    h2 = _leaky(h1 @ w2 + b2)
    h3 = _leaky(h2 @ w3 + b3)
    return h3


if __name__ == "__main__":
    key = jax.random.PRNGKey(0)
    kx, kp = jax.random.split(key)

    B, D = 8, D_IN
    # plausible inputs: bbox corners, score, 5 landmark (x, y) pairs
    x = jax.random.uniform(kx, (B, D), jnp.float32, 0.0, 1.0)
    # make bbox well-formed: x1 > x0, y1 > y0
    x = x.at[:, 2].set(x[:, 0] + 0.5 + x[:, 2])
    x = x.at[:, 3].set(x[:, 1] + 0.5 + x[:, 3])

    params = init_params(kp)

    y = posenet_forward(x, params)
    jax.block_until_ready(y)

    y_ref = posenet_reference(x, params)
    assert y.shape == (B, NN_LAYERS[-1])
    assert jnp.allclose(y, y_ref, rtol=1e-4, atol=1e-5), "mismatch vs reference"

    print("KERNEL_OK")
</pallas_src>

<mosaic_0001>
module attributes {stable_mosaic.version = 11 : i64} {
  func.func @posenet_kernel(%arg0: i32, %arg1: memref<8x15xf32, #tpu.memory_space<vmem>>, %arg2: memref<15x16xf32, #tpu.memory_space<vmem>>, %arg3: memref<1x16xf32, #tpu.memory_space<vmem>>, %arg4: memref<16x32xf32, #tpu.memory_space<vmem>>, %arg5: memref<1x32xf32, #tpu.memory_space<vmem>>, %arg6: memref<32x13xf32, #tpu.memory_space<vmem>>, %arg7: memref<1x13xf32, #tpu.memory_space<vmem>>, %arg8: memref<8x13xf32, #tpu.memory_space<vmem>>) attributes {dimension_semantics = [#tpu.dimension_semantics<parallel>], iteration_bounds = array<i64: 1>, scalar_prefetch = 0 : i64, scratch_operands = 0 : i64, tpu.core_type = #tpu.core_type<tc>, window_params = [{transform_indices = @transform_0, window_bounds = array<i64: 8, 15>}, {pipeline_mode = #tpu.pipeline_mode<synchronous>, transform_indices = @transform_1, window_bounds = array<i64: 15, 16>}, {pipeline_mode = #tpu.pipeline_mode<synchronous>, transform_indices = @transform_2, window_bounds = array<i64: 1, 16>}, {pipeline_mode = #tpu.pipeline_mode<synchronous>, transform_indices = @transform_3, window_bounds = array<i64: 16, 32>}, {pipeline_mode = #tpu.pipeline_mode<synchronous>, transform_indices = @transform_4, window_bounds = array<i64: 1, 32>}, {pipeline_mode = #tpu.pipeline_mode<synchronous>, transform_indices = @transform_5, window_bounds = array<i64: 32, 13>}, {pipeline_mode = #tpu.pipeline_mode<synchronous>, transform_indices = @transform_6, window_bounds = array<i64: 1, 13>}, {transform_indices = @transform_7, window_bounds = array<i64: 8, 13>}]} {
    %c0 = arith.constant 0 : index
    %c0_0 = arith.constant 0 : index
    %0 = vector.load %arg2[%c0, %c0_0] : memref<15x16xf32, #tpu.memory_space<vmem>>, vector<15x16xf32>
    %c0_1 = arith.constant 0 : index
    %c0_2 = arith.constant 0 : index
    %1 = vector.load %arg3[%c0_1, %c0_2] : memref<1x16xf32, #tpu.memory_space<vmem>>, vector<1x16xf32>
    %c0_3 = arith.constant 0 : index
    %c0_4 = arith.constant 0 : index
    %2 = vector.load %arg4[%c0_3, %c0_4] : memref<16x32xf32, #tpu.memory_space<vmem>>, vector<16x32xf32>
    %c0_5 = arith.constant 0 : index
    %c0_6 = arith.constant 0 : index
    %3 = vector.load %arg5[%c0_5, %c0_6] : memref<1x32xf32, #tpu.memory_space<vmem>>, vector<1x32xf32>
    %c0_7 = arith.constant 0 : index
    %c0_8 = arith.constant 0 : index
    %4 = vector.load %arg6[%c0_7, %c0_8] : memref<32x13xf32, #tpu.memory_space<vmem>>, vector<32x13xf32>
    %c0_9 = arith.constant 0 : index
    %c0_10 = arith.constant 0 : index
    %5 = vector.load %arg7[%c0_9, %c0_10] : memref<1x13xf32, #tpu.memory_space<vmem>>, vector<1x13xf32>
    %6 = tpu.iota {dimensions = array<i32: 1>} : vector<8x15xi32>
    %c2_i32 = arith.constant 2 : i32
    %c0_i32 = arith.constant 0 : i32
    %7 = arith.cmpi eq, %c2_i32, %c0_i32 : i32
    %c1_i32 = arith.constant 1 : i32
    %8 = arith.select %7, %c1_i32, %c2_i32 : i32
    %9 = vector.broadcast %8 : i32 to vector<8x15xi32>
    %10 = arith.remsi %6, %9 : vector<8x15xi32>
    %c0_i32_11 = arith.constant 0 : i32
    %11 = vector.broadcast %c0_i32_11 : i32 to vector<8x15xi32>
    %12 = arith.cmpi ne, %10, %11 : vector<8x15xi32>
    %c0_i32_12 = arith.constant 0 : i32
    %13 = vector.broadcast %c0_i32_12 : i32 to vector<8x15xi32>
    %14 = arith.cmpi slt, %10, %13 : vector<8x15xi32>
    %c0_i32_13 = arith.constant 0 : i32
    %15 = arith.cmpi slt, %8, %c0_i32_13 : i32
    %16 = vector.broadcast %15 : i1 to vector<8x15xi1>
    %17 = vector.broadcast %16 : vector<8x15xi1> to vector<8x15xi1>
    %18 = arith.xori %14, %17 : vector<8x15xi1>
    %19 = arith.andi %18, %12 : vector<8x15xi1>
    %20 = vector.broadcast %8 : i32 to vector<8x15xi32>
    %21 = arith.addi %10, %20 : vector<8x15xi32>
    %22 = arith.select %19, %21, %10 : vector<8x15xi1>, vector<8x15xi32>
    %c1_i32_14 = arith.constant 1 : i32
    %23 = vector.broadcast %c1_i32_14 : i32 to vector<8x15xi32>
    %24 = arith.cmpi eq, %22, %23 : vector<8x15xi32>
    %c0_i32_15 = arith.constant 0 : i32
    %c8_i32 = arith.constant 8 : i32
    %25 = arith.muli %c0_i32_15, %c8_i32 : i32
    %26 = tpu.assume_multiple %25, 8 : i32
    %27 = arith.index_cast %26 : i32 to index
    %c0_16 = arith.constant 0 : index
    %28 = vector.load %arg1[%27, %c0_16] : memref<8x15xf32, #tpu.memory_space<vmem>>, vector<8x15xf32>
    %29 = vector.extract_strided_slice %28 {offsets = [0, 2], sizes = [8, 1], strides = [1, 1]} : vector<8x15xf32> to vector<8x1xf32>
    %30 = vector.extract_strided_slice %28 {offsets = [0, 0], sizes = [8, 1], strides = [1, 1]} : vector<8x15xf32> to vector<8x1xf32>
    %31 = arith.subf %29, %30 : vector<8x1xf32>
    %cst = arith.constant 1.000000e-03 : f32
    %32 = vector.broadcast %cst : f32 to vector<8x1xf32>
    %33 = arith.addf %31, %32 : vector<8x1xf32>
    %34 = vector.extract_strided_slice %28 {offsets = [0, 3], sizes = [8, 1], strides = [1, 1]} : vector<8x15xf32> to vector<8x1xf32>
    %35 = vector.extract_strided_slice %28 {offsets = [0, 1], sizes = [8, 1], strides = [1, 1]} : vector<8x15xf32> to vector<8x1xf32>
    %36 = arith.subf %34, %35 : vector<8x1xf32>
    %cst_17 = arith.constant 1.000000e-03 : f32
    %37 = vector.broadcast %cst_17 : f32 to vector<8x1xf32>
    %38 = arith.addf %36, %37 : vector<8x1xf32>
    %cst_18 = arith.constant 1.000000e+00 : f32
    %39 = vector.broadcast %cst_18 : f32 to vector<8x1xf32>
    %40 = arith.divf %39, %33 : vector<8x1xf32>
    %cst_19 = arith.constant 1.000000e+00 : f32
    %41 = vector.broadcast %cst_19 : f32 to vector<8x1xf32>
    %42 = arith.divf %41, %38 : vector<8x1xf32>
    %43 = vector.extract_strided_slice %28 {offsets = [0, 9], sizes = [8, 1], strides = [1, 1]} : vector<8x15xf32> to vector<8x1xf32>
    %44 = vector.extract_strided_slice %28 {offsets = [0, 10], sizes = [8, 1], strides = [1, 1]} : vector<8x15xf32> to vector<8x1xf32>
    %45 = vector.shape_cast %43 : vector<8x1xf32> to vector<8x1xf32>
    %46 = vector.broadcast %45 : vector<8x1xf32> to vector<8x15xf32>
    %47 = vector.shape_cast %44 : vector<8x1xf32> to vector<8x1xf32>
    %48 = vector.broadcast %47 : vector<8x1xf32> to vector<8x15xf32>
    %49 = arith.select %24, %46, %48 : vector<8x15xi1>, vector<8x15xf32>
    %50 = vector.shape_cast %40 : vector<8x1xf32> to vector<8x1xf32>
    %51 = vector.broadcast %50 : vector<8x1xf32> to vector<8x15xf32>
    %52 = vector.shape_cast %42 : vector<8x1xf32> to vector<8x1xf32>
    %53 = vector.broadcast %52 : vector<8x1xf32> to vector<8x15xf32>
    %54 = arith.select %24, %51, %53 : vector<8x15xi1>, vector<8x15xf32>
    %55 = arith.subf %28, %49 : vector<8x15xf32>
    %56 = arith.mulf %55, %54 : vector<8x15xf32>
    %cst_20 = arith.constant dense<0.000000e+00> : vector<8x16xf32>
    %57 = tpu.matmul %56, %0, %cst_20 {dimension_numbers = #tpu.dot_dimension_numbers<[1], [0], [0], [1], [0, 0, 1, 1], [], []>} : vector<8x15xf32>, vector<15x16xf32>, vector<8x16xf32> -> vector<8x16xf32>
    %58 = vector.broadcast %1 : vector<1x16xf32> to vector<8x16xf32>
    %59 = arith.addf %57, %58 : vector<8x16xf32>
    %cst_21 = arith.constant 0.000000e+00 : f32
    %60 = vector.broadcast %cst_21 : f32 to vector<8x16xf32>
    %61 = arith.cmpf oge, %59, %60 : vector<8x16xf32>
    %cst_22 = arith.constant 0.00999999977 : f32
    %62 = vector.broadcast %cst_22 : f32 to vector<8x16xf32>
    %63 = arith.mulf %62, %59 : vector<8x16xf32>
    %64 = arith.select %61, %59, %63 : vector<8x16xi1>, vector<8x16xf32>
    %cst_23 = arith.constant dense<0.000000e+00> : vector<8x32xf32>
    %65 = tpu.matmul %64, %2, %cst_23 {dimension_numbers = #tpu.dot_dimension_numbers<[1], [0], [0], [1], [0, 0, 1, 1], [], []>} : vector<8x16xf32>, vector<16x32xf32>, vector<8x32xf32> -> vector<8x32xf32>
    %66 = vector.broadcast %3 : vector<1x32xf32> to vector<8x32xf32>
    %67 = arith.addf %65, %66 : vector<8x32xf32>
    %cst_24 = arith.constant 0.000000e+00 : f32
    %68 = vector.broadcast %cst_24 : f32 to vector<8x32xf32>
    %69 = arith.cmpf oge, %67, %68 : vector<8x32xf32>
    %cst_25 = arith.constant 0.00999999977 : f32
    %70 = vector.broadcast %cst_25 : f32 to vector<8x32xf32>
    %71 = arith.mulf %70, %67 : vector<8x32xf32>
    %72 = arith.select %69, %67, %71 : vector<8x32xi1>, vector<8x32xf32>
    %cst_26 = arith.constant dense<0.000000e+00> : vector<8x13xf32>
    %73 = tpu.matmul %72, %4, %cst_26 {dimension_numbers = #tpu.dot_dimension_numbers<[1], [0], [0], [1], [0, 0, 1, 1], [], []>} : vector<8x32xf32>, vector<32x13xf32>, vector<8x13xf32> -> vector<8x13xf32>
    %74 = vector.broadcast %5 : vector<1x13xf32> to vector<8x13xf32>
    %75 = arith.addf %73, %74 : vector<8x13xf32>
    %cst_27 = arith.constant 0.000000e+00 : f32
    %76 = vector.broadcast %cst_27 : f32 to vector<8x13xf32>
    %77 = arith.cmpf oge, %75, %76 : vector<8x13xf32>
    %cst_28 = arith.constant 0.00999999977 : f32
    %78 = vector.broadcast %cst_28 : f32 to vector<8x13xf32>
    %79 = arith.mulf %78, %75 : vector<8x13xf32>
    %80 = arith.select %77, %75, %79 : vector<8x13xi1>, vector<8x13xf32>
    %81 = arith.index_cast %26 : i32 to index
    %c0_29 = arith.constant 0 : index
    %82 = vector.load %arg8[%81, %c0_29] : memref<8x13xf32, #tpu.memory_space<vmem>>, vector<8x13xf32>
    tpu.vector_store %arg8[%81, %c0_29], %80 {strides = array<i32>} : memref<8x13xf32, #tpu.memory_space<vmem>>, vector<8x13xf32>,
    %c1_i32_30 = arith.constant 1 : i32
    return
  }
  func.func @transform_0(%arg0: i32) -> (i32, i32) {
    %c0_i32 = arith.constant 0 : i32
    %c0_i32_0 = arith.constant 0 : i32
    return %arg0, %c0_i32 : i32, i32
  }
  func.func @transform_1(%arg0: i32) -> (i32, i32) {
    %c0_i32 = arith.constant 0 : i32
    %c0_i32_0 = arith.constant 0 : i32
    %c0_i32_1 = arith.constant 0 : i32
    return %c0_i32, %c0_i32_0 : i32, i32
  }
  func.func @transform_2(%arg0: i32) -> (i32, i32) {
    %c0_i32 = arith.constant 0 : i32
    %c0_i32_0 = arith.constant 0 : i32
    %c0_i32_1 = arith.constant 0 : i32
    return %c0_i32, %c0_i32_0 : i32, i32
  }
  func.func @transform_3(%arg0: i32) -> (i32, i32) {
    %c0_i32 = arith.constant 0 : i32
    %c0_i32_0 = arith.constant 0 : i32
    %c0_i32_1 = arith.constant 0 : i32
    return %c0_i32, %c0_i32_0 : i32, i32
  }
  func.func @transform_4(%arg0: i32) -> (i32, i32) {
    %c0_i32 = arith.constant 0 : i32
    %c0_i32_0 = arith.constant 0 : i32
    %c0_i32_1 = arith.constant 0 : i32
    return %c0_i32, %c0_i32_0 : i32, i32
  }
  func.func @transform_5(%arg0: i32) -> (i32, i32) {
    %c0_i32 = arith.constant 0 : i32
    %c0_i32_0 = arith.constant 0 : i32
    %c0_i32_1 = arith.constant 0 : i32
    return %c0_i32, %c0_i32_0 : i32, i32
  }
  func.func @transform_6(%arg0: i32) -> (i32, i32) {
    %c0_i32 = arith.constant 0 : i32
    %c0_i32_0 = arith.constant 0 : i32
    %c0_i32_1 = arith.constant 0 : i32
    return %c0_i32, %c0_i32_0 : i32, i32
  }
  func.func @transform_7(%arg0: i32) -> (i32, i32) {
    %c0_i32 = arith.constant 0 : i32
    %c0_i32_0 = arith.constant 0 : i32
    return %arg0, %c0_i32 : i32, i32
  }
}

</mosaic_0001>

<bundles_post_ra>
// kernel: tpu_custom_call.1
= control target key start
LH: loop header
LB: loop body
LE: loop exit
PB: predicated region body
PF: predicated region fallthrough
CT: control target
= control target key end

     0   :  { %s432_s26 = smov 2   ;;  %v433_v1 = vmov 10   ;;  %s522_s0 = inlined_call_operand.vmem [shape: f32[8,15], index: 0, kind: input, shape index: {}]   ;;  %s523_s1 = inlined_call_operand.vmem [shape: f32[15,16], index: 1, kind: input, shape index: {}]   ;;  %s524_s2 = inlined_call_operand.vmem [shape: f32[1,16], index: 2, kind: input, shape index: {}]   ;;  %s525_s3 = inlined_call_operand.vmem [shape: f32[16,32], index: 3, kind: input, shape index: {}]   ;;  %s526_s4 = inlined_call_operand.vmem [shape: f32[1,32], index: 4, kind: input, shape index: {}]   ;;  %s527_s5 = inlined_call_operand.vmem [shape: f32[32,13], index: 5, kind: input, shape index: {}]   ;;  %s528_s6 = inlined_call_operand.vmem [shape: f32[1,13], index: 6, kind: input, shape index: {}]   ;;  %s529_s7 = inlined_call_operand.hbm [shape: f32[8,13], index: 7, kind: output, shape index: {}]  }
   0x1   :  { %v53_v0 = vld [vmem:[%s522_s0] sm:$0xff]  ;;  %404 = vset.pattern.permute.xlu1 %v433_v1 }
   0x2   :  { %55 = vrot.lane.b32.xlu0 %v53_v0, %s432_s26 }
   0x3   :  { %12 = vsyncpa [#allocation3], 0  ;;  %v434_v2 = vmov 9   ;;  %67 = vperm.xlu1 %404, %v53_v0   ;;  %v435_v3 = vmov 2   ;;  %v436_v4 = vmov 3   ;;  %v437_v8 = vmov 0.0  }
   0x4   :  { %403 = vset.pattern.permute.xlu0 %v434_v2  ;;  %370 = vmatprep.subr.mxu1 %v437_v8  ;;  %v28_v10 = vld [vmem:[%s523_s1 + $0x8] sm:$0x7f]  ;;  %vm93_vm0 = vcmask 1046528   ;;  %v27_v11 = vld [vmem:[%s523_s1] sm:$0xff]  ;;  %vm438_vm1 = vmmov 0   ;;  %v38_v12 = vlaneseq  ;;  %vm89_vm3 = vcmask 121856  }
   0x5   :  { %384 = vmatprep.subr.mxu0 %v437_v8  ;;  %371 = vmatpush3.msk.msra.mxu1 %vm93_vm0, %v28_v10  ;;  %v31_v23 = vld [vmem:[%s525_s3 + $0x8] sm:$0xff]  ;;  %v30_v24 = vld [vmem:[%s525_s3] sm:$0xff]  ;;  %v36_v25 = vld [vmem:[%s527_s5 + $0x18] sm:$0xff]  ;;  %vm176_vm5 = vcmask 130048   ;;  %vm259_vm7 = vcmask 261120   ;;  %vm336_vm9 = vcmask 105472  }
   0x6   :  { %63 = vperm.xlu0 %403, %v53_v0   ;;  %372 = vmatprep.subr.mxu1 %v437_v8  ;;  %v39_v13 = vand.u32 127, %v38_v12  ;;  %v352_v26 = vld [vmem:[%s524_s2] ss:$0 sm:$0xff]  ;;  %v35_v32 = vld [vmem:[%s527_s5 + $0x10] sm:$0xff]  ;;  %v34_v33 = vld [vmem:[%s527_s5 + $0x8] sm:$0xff] }
   0x7   :  { %405 = vset.pattern.permute.xlu1 %v435_v3  ;;  %373 = vmatpush3.msra.mxu1 %v27_v11  ;;  %v33_v34 = vld [vmem:[%s527_s5] sm:$0xff]  ;;  %s439_s5 = smov [#allocation2]  }
   0x8   :  { %374 = vmatprep.mubr.msk.f32.mxu1 %vm438_vm1, %v437_v8  ;;  %377 = vmatprep.subr.mxu1 %v437_v8  ;;  %v44_v15 = vand.u32 1, %v39_v13  ;;  %v355_v35 = vld [vmem:[%s526_s4] ss:$0 sm:$0xff]  ;;  %s344_s22 = sshll.u32 %s439_s5, 4  ;;  %s345_s22 = int_to_ptr.vmem [resolvable:$true] %s344_s22 }
   0x9   :  { %392 = vmatprep.mubr.msk.f32.mxu0 %vm438_vm1, %v437_v8  ;;  %385 = vmatpush3.msra.mxu0 %v36_v25  ;;  %v357_v41 = vld [vmem:[%s528_s6] ss:$0 sm:$0xff]  ;;  %s410_s4 = scalar_lea.vmem %s345_s22, 128  ;;  %p415_p1 = scmp.lt.s32.totalorder %s345_s22, %s345_s22 }
   0xa   :  { %407 = vset.pattern.permute.xlu0 %v436_v4  ;;  %vm52_vm2 = vcmp.eq.s32.totalorder %v44_v15, 1  ;;  %386 = vmatprep.subr.mxu0 %v437_v8  ;;  %p411_p0 = scmp.ne.s32.totalorder %s345_s22, %s410_s4  ;;  %p416_p2 = scmp.lt.s32.totalorder %s410_s4, %s410_s4 }
   0xb   :  { %387 = vmatpush3.msra.mxu0 %v35_v32 }
   0xc   :  { %388 = vmatprep.subr.mxu0 %v437_v8  ;;  %p417_p3 = por %p416_p2, %p415_p1 }
   0xd   :  { %389 = vmatpush3.msra.mxu0 %v34_v33 }
   0xe   :  { %390 = vmatprep.subr.mxu0 %v437_v8  ;;  %p418_p4 = pnand %p417_p3, %p411_p0 }
   0xf   :  { %391 = vmatpush3.msra.mxu0 %v33_v34 }
  0x74   :  { %v56_v5 = vpop.permute.xlu0 %55 }
  0x75   :  { %v58_v6 = vsub.f32 %v53_v0, %v56_v5 }
  0x77   :  { %v59_v7 = vadd.f32 0.001, %v58_v6 }
  0x79   :  { %408 = vrcp.f32 %v59_v7 }
  0x7e   :  { %v68_v14 = vpop.permute.xlu1 %67 }
  0x81   :  { %v64_v16 = vpop.permute.xlu0 %63 }
  0x82   :  { %v70_v18 = vsel %vm52_vm2, %v64_v16, %v68_v14 }
  0x83   :  { %v81_v19 = vsub.f32 %v53_v0, %v70_v18 }
  0x86   :  { %v409_v9 = vpop.eup %408 }
  0x87   :  { %73 = vperm.xlu1 %405, %v409_v9  }
  0x8b   :  { %406 = vset.pattern.permute.xlu1 %v436_v4 }
  0x8c   :  { %77 = vperm.xlu1 %406, %v409_v9  }
 0x102   :  { %v74_v17 = vpop.permute.xlu1 %73 }
 0x107   :  { %v78_v20 = vpop.permute.xlu1 %77 }
 0x108   :  { %v80_v21 = vsel %vm52_vm2, %v74_v17, %v78_v20 }
 0x109   :  { %v82_v22 = vmul.f32 %v81_v19, %v80_v21 }
 0x10b   :  { %375 = vmatmul.mubr.msk.f32.vlgmr.msra.gmra.mxu1 %vm89_vm3, %v82_v22 }
 0x10c   :  { %381 = vmatprep.mubr.msk.f32.mxu1 %vm438_vm1, %v437_v8  ;;  %378 = vmatpush3.msra.mxu1 %v31_v23 }
 0x10d   :  { %379 = vmatprep.subr.mxu1 %v437_v8 }
 0x10e   :  { %380 = vmatpush3.msra.mxu1 %v30_v24 }
 0x1cb   :  { %v163_v27 = vpop.f32.mrf.mxu1 }
 0x1cc   :  { %v164_v28 = vadd.f32 %v352_v26, %v163_v27 }
 0x1cd   :  { %v376_v29 = vpop.f32.mrf.mxu1 }
 0x1ce   :  { %vm167_vm4 = vcmp.ge.f32.partialorder %v164_v28, 0.0  ;;  %v168_v30 = vmul.f32 0.01, %v164_v28 }
 0x1d0   :  { %v169_v31 = vsel %vm167_vm4, %v164_v28, %v168_v30 }
 0x1d1   :  { %382 = vmatmul.mubr.msk.f32.vlgmr.msra.gmra.mxu1 %vm176_vm5, %v169_v31 }
 0x291   :  { %v246_v36 = vpop.f32.mrf.mxu1 }
 0x292   :  { %v247_v37 = vadd.f32 %v355_v35, %v246_v36 }
 0x293   :  { %v383_v38 = vpop.f32.mrf.mxu1 }
 0x294   :  { %vm250_vm6 = vcmp.ge.f32.partialorder %v247_v37, 0.0  ;;  %v251_v39 = vmul.f32 0.01, %v247_v37 }
 0x296   :  { %v252_v40 = vsel %vm250_vm6, %v247_v37, %v251_v39 }
 0x297   :  { %393 = vmatmul.mubr.msk.f32.vlgmr.msra.gmra.mxu0 %vm259_vm7, %v252_v40 }
 0x357   :  { %v329_v42 = vpop.f32.mrf.mxu0 }
 0x358   :  { %v330_v43 = vadd.f32 %v357_v41, %v329_v42 }
 0x359   :  { %v394_v44 = vpop.f32.mrf.mxu0 }
 0x35a   :  { %v334_v45 = vmul.f32 0.01, %v330_v43  ;;  %vm333_vm8 = vcmp.ge.f32.partialorder %v330_v43, 0.0 }
 0x35c   :  { %v335_v46 = vsel %vm333_vm8, %v330_v43, %v334_v45 }
 0x35d   :  { %337 = vst.msk [vmem:[#allocation2] sm:$0xff] %vm336_vm9, %v335_v46 }
 0x35e   :  { %421 = shalt.err (!%p418_p4)
}
 0x35f   :  { %347 = dma.vmem_to_hbm [thread:$0]  %s345_s22, 128, %s529_s7, [#allocation3]  }
 0x360   :  { %430 = dma.done.wait [#allocation3], 128  }
 0x361   :  { %431 = vsyncadd [#allocation3], 4294967168 }
 0x362   :  { %351 = vsyncpa [#allocation3], 1 }

</bundles_post_ra>
